<compile_context>
chip_gen: v7x
topology: tpu7x:2x2x1
jax: 0.10.0
libtpu: 0.0.40
codegen_flags: <defaults>
</compile_context>

<pallas_src>
import numpy as np
import jax
import jax.numpy as jnp
from jax.experimental import pallas as pl
from jax.experimental.pallas import tpu as pltpu


def _adaptive_avg_pool_matrix(out_size: int, in_size: int) -> np.ndarray:
    """Row s averages input indices [floor(s*in/out), ceil((s+1)*in/out)) --
    exactly PyTorch's adaptive_avg_pool2d bin rule (applied per spatial dim)."""
    P = np.zeros((out_size, in_size), dtype=np.float32)
    for s in range(out_size):
        start = (s * in_size) // out_size
        end = -((-(s + 1) * in_size) // out_size)  # ceil((s+1)*in/out)
        P[s, start:end] = 1.0 / float(end - start)
    return P


def _bilinear_upsample_matrix(out_size: int, in_size: int) -> np.ndarray:
    """PyTorch bilinear (align_corners=False) interpolation weights, per axis."""
    U = np.zeros((out_size, in_size), dtype=np.float32)
    if in_size == 1:
        U[:, 0] = 1.0
        return U
    scale = in_size / out_size
    for i in range(out_size):
        src = scale * (i + 0.5) - 0.5
        src = max(src, 0.0)                      # PyTorch clamps negative coords to 0
        i0 = min(int(np.floor(src)), in_size - 1)
        i1 = min(i0 + 1, in_size - 1)
        lam = src - float(i0)
        U[i, i0] += 1.0 - lam
        U[i, i1] += lam
    return U


def _tpu_vmem_capacity_bytes(default_bytes: int = 64 * 1024 * 1024) -> int:
    """Generation-aware VMEM capacity (v5e/v6e: 128 MiB, v7x: 64 MiB per TC).
    Falls back to the conservative v7x value if the query is unavailable."""
    try:
        info = pltpu.get_tpu_info()
        cap = int(getattr(info, "vmem_capacity_bytes", 0))
        if cap > 0:
            return cap
    except Exception:
        pass
    return default_bytes


def _divisors(n: int):
    out = set()
    for d in range(1, int(n ** 0.5) + 1):
        if n % d == 0:
            out.add(d)
            out.add(n // d)
    return sorted(out)


def _choose_tiles(N, Cin, Cout, HW, SS, x_itemsize, out_itemsize,
                  vmem_capacity_bytes, two_cores):
    """Pick (Nb, Cin_blk, vmem_limit_bytes).

    Blocks are sized from a per-block byte model so double-buffered slabs stay
    within ~40% of this generation's VMEM; Nb then grows to amortize the
    ~0.35us/grid-step overhead.  On 2-TC chips (v7x) the parallel N axis keeps
    >= 2 blocks whenever N >= 2 so both TensorCores get work; single-TC chips
    (v5e/v6e) grow Nb until the (larger, 128 MiB-derived) budget binds.
    """
    budget = int(0.40 * vmem_capacity_bytes)

    def vmem_bytes(nb, cin_blk):
        x_blk = nb * cin_blk * HW * x_itemsize * 2     # input block, double-buffered
        o_blk = nb * Cout * HW * out_itemsize * 2      # output block, double-buffered
        w_res = Cin * Cout * 4 * 2                     # resident folded weight (f32)
        mats = 2 * (HW * SS * 2) * 2                   # bf16 pool + upsample matrices
        bias = Cout * 4 * 2
        acc = nb * Cout * SS * 4                       # f32 accumulator scratch
        return x_blk + o_blk + w_res + mats + bias + acc

    # --- Cin chunk: largest 128-aligned divisor of Cin that fits the budget ---
    if vmem_bytes(1, Cin) <= budget:
        cin_blk = Cin
    else:
        cands = [d for d in _divisors(Cin) if d % 128 == 0]
        if not cands:
            cands = [d for d in _divisors(Cin) if d % 8 == 0]
        if not cands:
            cands = [Cin]                              # cannot chunk cleanly
        fitting = [d for d in cands if vmem_bytes(1, d) <= budget]
        cin_blk = max(fitting) if fitting else min(cands)

    # --- batch block: largest divisor of N that fits the budget -------------
    nb = 1
    for d in _divisors(N):
        if vmem_bytes(d, cin_blk) > budget:
            continue
        if two_cores and N >= 2 and (N // d) < 2:
            continue                                   # keep both TCs fed on v7x
        nb = max(nb, d)

    # vmem_limit from the actual block math, with headroom under the physical
    # ceiling (hard failure on v7x if exceeded).
    need = vmem_bytes(nb, cin_blk)
    vmem_limit = int(min(vmem_capacity_bytes - (4 << 20),
                         max(32 << 20, 2 * need)))
    vmem_limit = max(vmem_limit, 16 << 20)
    return nb, cin_blk, vmem_limit


def _pspdec_kernel(x_ref, w_ref, bias_ref, pk_ref, uk_ref, o_ref, acc_ref):
    c = pl.program_id(1)                    # Cin-chunk (reduction) axis

    @pl.when(c == 0)
    def _():
        acc_ref[...] = jnp.zeros_like(acc_ref)

    nb, cin_blk, hw = x_ref.shape
    ss = pk_ref.shape[1]
    cout = w_ref.shape[1]

    # x arrives in its native dtype (no wrapper-side cast pass over HBM);
    # cast to bf16 in VMEM for the MXU.
    x = x_ref[...].astype(jnp.bfloat16)                        # (nb, cin_blk, HW)

    # Adaptive average pool over flattened space: fold the batch into M so it
    # is one large matmul instead of nb batched ones; accumulate in f32.
    pooled = jnp.dot(x.reshape(nb * cin_blk, hw), pk_ref[...],
                     preferred_element_type=jnp.float32)        # (nb*cin_blk, SS)
    pooled = pooled.reshape(nb, cin_blk, ss)

    # 1x1 conv with the BN scale folded into the weight.  The full (Cin, Cout)
    # weight is VMEM-resident (constant index_map) -> slice this chunk's rows
    # on the sublane axis; accumulate over Cin chunks in f32 scratch.
    start = c * cin_blk
    if cin_blk % 8 == 0:
        start = pl.multiple_of(start, cin_blk)
    w = w_ref[pl.ds(start, cin_blk), :]                         # (cin_blk, Cout) f32
    acc_ref[...] += jnp.einsum('co,ncs->nos', w, pooled,
                               preferred_element_type=jnp.float32)

    @pl.when(c == pl.num_programs(1) - 1)
    def _():
        # Folded BN bias + ReLU (f32), then bilinear upsample back to H*W
        # (lane-dense output store), again with the batch folded into M.
        f = jnp.maximum(acc_ref[...] + bias_ref[...][None, :, :], 0.0)  # (nb,Cout,SS)
        f2d = f.astype(uk_ref.dtype).reshape(nb * cout, ss)
        out = jnp.dot(f2d, uk_ref[...],
                      preferred_element_type=jnp.float32)               # (nb*Cout, HW)
        o_ref[...] = out.reshape(nb, cout, hw).astype(o_ref.dtype)


def pspdec_forward(x, conv_w, bn_gamma, bn_beta, bn_mean, bn_var, down_size,
                   eps=1e-3):
    N, Cin, H, W = x.shape
    Cout = conv_w.shape[0]
    S = int(down_size)
    HW, SS = H * W, S * S

    # Fold eval-mode BatchNorm into the conv: scale into the weight, bias kept.
    inv_std = 1.0 / jnp.sqrt(bn_var.astype(jnp.float32) + eps)
    scale = bn_gamma.astype(jnp.float32) * inv_std                       # (Cout,)
    bias = bn_beta.astype(jnp.float32) - bn_mean.astype(jnp.float32) * scale
    # (Cin, Cout) layout: Cin on the sublane axis so per-chunk slices inside
    # the kernel are cheap sublane slices of a VMEM-resident weight.
    w_cico = (conv_w.reshape(Cout, Cin).astype(jnp.float32)
              * scale[:, None]).T                                        # (Cin, Cout)
    bias2d = bias.reshape(Cout, 1)

    # Kronecker-factored pooling / upsample matrices over flattened H*W.
    ph = _adaptive_avg_pool_matrix(S, H)        # (S, H)
    pw = _adaptive_avg_pool_matrix(S, W)        # (S, W)
    uh = _bilinear_upsample_matrix(H, S)        # (H, S)
    uw = _bilinear_upsample_matrix(W, S)        # (W, S)
    pk = jnp.asarray(np.kron(ph, pw).T.copy(), dtype=jnp.bfloat16)  # (H*W, S*S)
    uk = jnp.asarray(np.kron(uh, uw).T.copy(), dtype=jnp.bfloat16)  # (S*S, H*W)

    # No dtype cast of x in the wrapper -- DMA it as-is and cast in-kernel.
    x_flat = x.reshape(N, Cin, HW)
    out_dtype = x.dtype
    x_itemsize = jnp.dtype(x.dtype).itemsize
    out_itemsize = jnp.dtype(out_dtype).itemsize

    vmem_cap = _tpu_vmem_capacity_bytes()
    two_cores = vmem_cap <= 96 * 1024 * 1024    # v7x: 64 MiB per TC, 2 TCs/chip
    nb, cin_blk, vmem_limit = _choose_tiles(
        N, Cin, Cout, HW, SS, x_itemsize, out_itemsize, vmem_cap, two_cores)
    grid = (N // nb, Cin // cin_blk)

    out_flat = pl.pallas_call(
        _pspdec_kernel,
        out_shape=jax.ShapeDtypeStruct((N, Cout, HW), out_dtype),
        grid_spec=pltpu.PrefetchScalarGridSpec(
            num_scalar_prefetch=0,
            grid=grid,
            in_specs=[
                pl.BlockSpec((nb, cin_blk, HW), lambda n, c: (n, c, 0)),  # x (native dtype)
                pl.BlockSpec((Cin, Cout), lambda n, c: (0, 0)),           # resident folded W
                pl.BlockSpec((Cout, 1), lambda n, c: (0, 0)),             # folded bias
                pl.BlockSpec((HW, SS), lambda n, c: (0, 0)),              # pooling matrix
                pl.BlockSpec((SS, HW), lambda n, c: (0, 0)),              # upsample matrix
            ],
            out_specs=pl.BlockSpec((nb, Cout, HW), lambda n, c: (n, 0, 0)),
            scratch_shapes=[pltpu.VMEM((nb, Cout, SS), jnp.float32)],
        ),
        compiler_params=pltpu.CompilerParams(
            dimension_semantics=("parallel", "arbitrary"),
            vmem_limit_bytes=int(vmem_limit),
        ),
    )(x_flat, w_cico, bias2d, pk, uk)

    return out_flat.reshape(N, Cout, H, W)


if __name__ == "__main__":
    # nIn=4, nOut=8, downSize=4, input (2, 4, 16, 16)
    N, Cin, Cout, H, W, S = 2, 4, 8, 16, 16, 4
    key = jax.random.PRNGKey(0)
    k = jax.random.split(key, 6)
    x = jax.random.normal(k[0], (N, Cin, H, W), jnp.float32)
    conv_w = 0.5 * jax.random.normal(k[1], (Cout, Cin, 1, 1), jnp.float32)
    gamma = 1.0 + 0.1 * jax.random.normal(k[2], (Cout,), jnp.float32)
    beta = 0.1 * jax.random.normal(k[3], (Cout,), jnp.float32)
    mean = 0.1 * jax.random.normal(k[4], (Cout,), jnp.float32)
    var = jnp.abs(jax.random.normal(k[5], (Cout,), jnp.float32)) + 0.5

    out = jax.block_until_ready(
        pspdec_forward(x, conv_w, gamma, beta, mean, var, S))
    assert out.shape == (N, Cout, H, W)
    assert out.dtype == x.dtype

    # pure-JAX f32 reference with identical semantics
    ph = jnp.asarray(_adaptive_avg_pool_matrix(S, H))
    pw = jnp.asarray(_adaptive_avg_pool_matrix(S, W))
    uh = jnp.asarray(_bilinear_upsample_matrix(H, S))
    uw = jnp.asarray(_bilinear_upsample_matrix(W, S))
    pooled = jnp.einsum('nchw,sh,tw->ncst', x, ph, pw)
    f = jnp.einsum('oc,ncst->nost', conv_w.reshape(Cout, Cin), pooled)
    inv_std = 1.0 / jnp.sqrt(var + 1e-3)
    f = jnp.maximum(
        (f - mean[None, :, None, None]) * (gamma * inv_std)[None, :, None, None]
        + beta[None, :, None, None], 0.0)
    ref = jnp.einsum('nost,hs,wt->nohw', f, uh, uw)

    # bf16 in-kernel activations / pool / upsample matrices (f32 accumulation,
    # f32 output) => loosened tolerance vs. the pure-f32 reference.
    np.testing.assert_allclose(np.asarray(out, dtype=np.float32),
                               np.asarray(ref), rtol=2e-2, atol=2e-2)
    print("KERNEL_OK")
</pallas_src>

<mosaic_0001>
module attributes {stable_mosaic.version = 11 : i64} {
  func.func @_pspdec_kernel(%arg0: i32, %arg1: i32, %arg2: memref<1x4x256xf32, #tpu.memory_space<vmem>>, %arg3: memref<4x8xf32, #tpu.memory_space<vmem>>, %arg4: memref<8x1xf32, #tpu.memory_space<vmem>>, %arg5: memref<256x16xbf16, #tpu.memory_space<vmem>>, %arg6: memref<16x256xbf16, #tpu.memory_space<vmem>>, %arg7: memref<1x8x256xf32, #tpu.memory_space<vmem>>, %arg8: memref<1x8x16xf32, #tpu.memory_space<vmem>>) attributes {dimension_semantics = [#tpu.dimension_semantics<parallel>, #tpu.dimension_semantics<arbitrary>], iteration_bounds = array<i64: 2, 1>, scalar_prefetch = 0 : i64, scratch_operands = 1 : i64, tpu.core_type = #tpu.core_type<tc>, window_params = [{transform_indices = @transform_0, window_bounds = array<i64: 1, 4, 256>}, {pipeline_mode = #tpu.pipeline_mode<synchronous>, transform_indices = @transform_1, window_bounds = array<i64: 4, 8>}, {pipeline_mode = #tpu.pipeline_mode<synchronous>, transform_indices = @transform_2, window_bounds = array<i64: 8, 1>}, {pipeline_mode = #tpu.pipeline_mode<synchronous>, transform_indices = @transform_3, window_bounds = array<i64: 256, 16>}, {pipeline_mode = #tpu.pipeline_mode<synchronous>, transform_indices = @transform_4, window_bounds = array<i64: 16, 256>}, {transform_indices = @transform_5, window_bounds = array<i64: 1, 8, 256>}]} {
    %c0_i32 = arith.constant 0 : i32
    %0 = arith.cmpi eq, %arg1, %c0_i32 : i32
    %1 = arith.extui %0 : i1 to i32
    %c0_i32_0 = arith.constant 0 : i32
    %2 = arith.cmpi ne, %1, %c0_i32_0 : i32
    scf.if %2 {
      %cst_15 = arith.constant 0.000000e+00 : f32
      %20 = vector.broadcast %cst_15 : f32 to vector<1x8x16xf32>
      %c0_16 = arith.constant 0 : index
      %c0_17 = arith.constant 0 : index
      %c0_18 = arith.constant 0 : index
      %21 = vector.load %arg8[%c0_16, %c0_17, %c0_18] : memref<1x8x16xf32, #tpu.memory_space<vmem>>, vector<1x8x16xf32>
      tpu.vector_store %arg8[%c0_16, %c0_17, %c0_18], %20 {strides = array<i32>} : memref<1x8x16xf32, #tpu.memory_space<vmem>>, vector<1x8x16xf32>,
    } else {
    }
    %c0 = arith.constant 0 : index
    %c0_1 = arith.constant 0 : index
    %c0_2 = arith.constant 0 : index
    %3 = vector.load %arg2[%c0, %c0_1, %c0_2] : memref<1x4x256xf32, #tpu.memory_space<vmem>>, vector<1x4x256xf32>
    %4 = arith.truncf %3 : vector<1x4x256xf32> to vector<1x4x256xbf16>
    %5 = vector.shape_cast %4 : vector<1x4x256xbf16> to vector<4x256xbf16>
    %c0_3 = arith.constant 0 : index
    %c0_4 = arith.constant 0 : index
    %6 = vector.load %arg5[%c0_3, %c0_4] : memref<256x16xbf16, #tpu.memory_space<vmem>>, vector<256x16xbf16>
    %cst = arith.constant dense<0.000000e+00> : vector<4x16xf32>
    %7 = tpu.matmul %5, %6, %cst {dimension_numbers = #tpu.dot_dimension_numbers<[1], [0], [0], [1], [0, 0, 1, 1], [], []>} : vector<4x256xbf16>, vector<256x16xbf16>, vector<4x16xf32> -> vector<4x16xf32>
    %8 = vector.shape_cast %7 : vector<4x16xf32> to vector<1x4x16xf32>
    %c4_i32 = arith.constant 4 : i32
    %9 = arith.muli %arg1, %c4_i32 : i32
    %10 = arith.index_cast %9 : i32 to index
    %c0_5 = arith.constant 0 : index
    %11 = vector.load %arg3[%10, %c0_5] : memref<4x8xf32, #tpu.memory_space<vmem>>, vector<4x8xf32>
    %c0_6 = arith.constant 0 : index
    %c0_7 = arith.constant 0 : index
    %c0_8 = arith.constant 0 : index
    %12 = vector.load %arg8[%c0_6, %c0_7, %c0_8] : memref<1x8x16xf32, #tpu.memory_space<vmem>>, vector<1x8x16xf32>
    "tpu.trace_start"() <{level = 10 : i32, message = "co,ncs->nos"}> : () -> ()
    %cst_9 = arith.constant dense<0.000000e+00> : vector<1x16x8xf32>
    %13 = tpu.matmul %8, %11, %cst_9 {dimension_numbers = #tpu.dot_dimension_numbers<[1], [0], [0, 2], [1], [0, 0, 0, 2, 1, 1], [], []>} : vector<1x4x16xf32>, vector<4x8xf32>, vector<1x16x8xf32> -> vector<1x16x8xf32>
    %14 = tpu.transpose %13, [0, 2, 1] : vector<1x16x8xf32> -> vector<1x8x16xf32>
    "tpu.trace_stop"() : () -> ()
    %15 = arith.addf %12, %14 : vector<1x8x16xf32>
    %c0_10 = arith.constant 0 : index
    %c0_11 = arith.constant 0 : index
    %c0_12 = arith.constant 0 : index
    %16 = vector.load %arg8[%c0_10, %c0_11, %c0_12] : memref<1x8x16xf32, #tpu.memory_space<vmem>>, vector<1x8x16xf32>
    tpu.vector_store %arg8[%c0_10, %c0_11, %c0_12], %15 {strides = array<i32>} : memref<1x8x16xf32, #tpu.memory_space<vmem>>, vector<1x8x16xf32>,
    %c0_i32_13 = arith.constant 0 : i32
    %17 = arith.cmpi eq, %arg1, %c0_i32_13 : i32
    %18 = arith.extui %17 : i1 to i32
    %c0_i32_14 = arith.constant 0 : i32
    %19 = arith.cmpi ne, %18, %c0_i32_14 : i32
    scf.if %19 {
      %c0_15 = arith.constant 0 : index
      %c0_16 = arith.constant 0 : index
      %c0_17 = arith.constant 0 : index
      %20 = vector.load %arg8[%c0_15, %c0_16, %c0_17] : memref<1x8x16xf32, #tpu.memory_space<vmem>>, vector<1x8x16xf32>
      %c0_18 = arith.constant 0 : index
      %c0_19 = arith.constant 0 : index
      %21 = vector.load %arg4[%c0_18, %c0_19] : memref<8x1xf32, #tpu.memory_space<vmem>>, vector<8x1xf32>
      %22 = vector.shape_cast %21 : vector<8x1xf32> to vector<1x8x1xf32>
      %23 = vector.broadcast %22 : vector<1x8x1xf32> to vector<1x8x16xf32>
      %24 = arith.addf %20, %23 : vector<1x8x16xf32>
      %cst_20 = arith.constant 0.000000e+00 : f32
      %25 = vector.broadcast %cst_20 : f32 to vector<1x8x16xf32>
      %26 = arith.maximumf %24, %25 : vector<1x8x16xf32>
      %27 = arith.truncf %26 : vector<1x8x16xf32> to vector<1x8x16xbf16>
      %28 = vector.shape_cast %27 : vector<1x8x16xbf16> to vector<8x16xbf16>
      %c0_21 = arith.constant 0 : index
      %c0_22 = arith.constant 0 : index
      %29 = vector.load %arg6[%c0_21, %c0_22] : memref<16x256xbf16, #tpu.memory_space<vmem>>, vector<16x256xbf16>
      %cst_23 = arith.constant dense<0.000000e+00> : vector<8x256xf32>
      %30 = tpu.matmul %28, %29, %cst_23 {dimension_numbers = #tpu.dot_dimension_numbers<[1], [0], [0], [1], [0, 0, 1, 1], [], []>} : vector<8x16xbf16>, vector<16x256xbf16>, vector<8x256xf32> -> vector<8x256xf32>
      %31 = vector.shape_cast %30 : vector<8x256xf32> to vector<1x8x256xf32>
      %c0_24 = arith.constant 0 : index
      %c0_25 = arith.constant 0 : index
      %c0_26 = arith.constant 0 : index
      %32 = vector.load %arg7[%c0_24, %c0_25, %c0_26] : memref<1x8x256xf32, #tpu.memory_space<vmem>>, vector<1x8x256xf32>
      tpu.vector_store %arg7[%c0_24, %c0_25, %c0_26], %31 {strides = array<i32>} : memref<1x8x256xf32, #tpu.memory_space<vmem>>, vector<1x8x256xf32>,
    } else {
    }
    return
  }
  func.func @transform_0(%arg0: i32, %arg1: i32) -> (i32, i32, i32) {
    %c0_i32 = arith.constant 0 : i32
    %c0_i32_0 = arith.constant 0 : i32
    return %arg0, %arg1, %c0_i32 : i32, i32, i32
  }
  func.func @transform_1(%arg0: i32, %arg1: i32) -> (i32, i32) {
    %c0_i32 = arith.constant 0 : i32
    %c0_i32_0 = arith.constant 0 : i32
    %c0_i32_1 = arith.constant 0 : i32
    return %c0_i32, %c0_i32_0 : i32, i32
  }
  func.func @transform_2(%arg0: i32, %arg1: i32) -> (i32, i32) {
    %c0_i32 = arith.constant 0 : i32
    %c0_i32_0 = arith.constant 0 : i32
    %c0_i32_1 = arith.constant 0 : i32
    return %c0_i32, %c0_i32_0 : i32, i32
  }
  func.func @transform_3(%arg0: i32, %arg1: i32) -> (i32, i32) {
    %c0_i32 = arith.constant 0 : i32
    %c0_i32_0 = arith.constant 0 : i32
    %c0_i32_1 = arith.constant 0 : i32
    return %c0_i32, %c0_i32_0 : i32, i32
  }
  func.func @transform_4(%arg0: i32, %arg1: i32) -> (i32, i32) {
    %c0_i32 = arith.constant 0 : i32
    %c0_i32_0 = arith.constant 0 : i32
    %c0_i32_1 = arith.constant 0 : i32
    return %c0_i32, %c0_i32_0 : i32, i32
  }
  func.func @transform_5(%arg0: i32, %arg1: i32) -> (i32, i32, i32) {
    %c0_i32 = arith.constant 0 : i32
    %c0_i32_0 = arith.constant 0 : i32
    %c0_i32_1 = arith.constant 0 : i32
    return %arg0, %c0_i32, %c0_i32_0 : i32, i32, i32
  }
}

</mosaic_0001>

<bundles_post_ra>
// kernel: tpu_custom_call.1
= control target key start
LH: loop header
LB: loop body
LE: loop exit
PB: predicated region body
PF: predicated region fallthrough
CT: control target
= control target key end

     0   :  { %10 = vsyncpa [#allocation4], 0  ;;  %s1184_s0 = inlined_call_operand.vmem [shape: f32[2,4,256], index: 0, kind: input, shape index: {}]   ;;  %s1185_s1 = inlined_call_operand.vmem [shape: f32[4,8], index: 1, kind: input, shape index: {}]   ;;  %s1186_s2 = inlined_call_operand.vmem [shape: f32[8,1], index: 2, kind: input, shape index: {}]   ;;  %s1187_s3 = inlined_call_operand.vmem [shape: bf16[256,16], index: 3, kind: input, shape index: {}]   ;;  %s1188_s4 = inlined_call_operand.vmem [shape: bf16[16,256], index: 4, kind: input, shape index: {}]   ;;  %s1189_s5 = inlined_call_operand.hbm [shape: f32[2,8,256], index: 5, kind: output, shape index: {}]  }
   0x1   :  { %12 = vsyncpa [#allocation4 + $0x1], 0  ;;  %s1009_s18 = smov 0   ;;  %s1011_s19 = smov 0  }
   0x2   :  { %s1013_s20 = smov 0   ;;  %s1015_s21 = smov 0  }
   0x3   :  { %s1017_s22 = smov 0   ;;  %s1019_s23 = smov 0  }
   0x4 LB: > { %s751_s24 = sadd.s32 4294967295, %s974_s23   ;;  %s752_s25 = sadd.s32 4294967294, %s974_s23   ;;  %s974_s23 = sphi %s1019_s23, %s18_s23   ;;  %s970_s22 = sphi %s1017_s22, %s1196_s22   ;;  %s966_s21 = sphi %s1015_s21, %s1195_s21   ;;  %s962_s20 = sphi %s1013_s20, %s1194_s20   ;;  %s958_s19 = sphi %s1011_s19, %s1193_s19   ;;  %s954_s18 = sphi %s1009_s18, %s1192_s18  }
   0x5   : > { %s30_s26 = sadd.s32 1, %s970_s22  ;;  %s149_s27 = sadd.s32 1, %s962_s20 }
   0x6   : > { %p32_p0 = scmp.ge.s32.totalorder %s30_s26, 2  ;;  %p159_p1 = scmp.ne.s32.totalorder %s962_s20, %s958_s19 }
   0x7   : > { %p160_p2 = scmp.eq.s32.totalorder %s751_s24, 1  ;;  %p165_p3 = scmp.ne.s32.totalorder %s958_s19, %s954_s18 }
   0x8   : > { %s1198_s26 = smov (%p32_p0, %s30_s26), 0  ;;  %p166_p5 = scmp.eq.s32.totalorder %s752_s25, 1 }
   0x9   : > { %p1049_p4 = por %p160_p2, %p159_p1  ;;  %s146_s29 = ssub.s32 %s970_s22, %s1198_s26 }
   0xa   : > { %p755_p6 = scmp.ge.s32.totalorder %s974_s23, 1  ;;  %p147_p7 = scmp.eq.s32.totalorder %s146_s29, 0 }
   0xb   : > { %p1056_p8 = por %p166_p5, %p165_p3  ;;  %p208_p9 = scmp.lt.s32.totalorder %s974_s23, 3 }
   0xc   : > { %s1062_s6 = scalar_select %p147_p7, %s962_s20, %s149_s27  }
   0xd   : > { %p209_p10 = pnand %p755_p6, %p208_p9 }
   0xe   : > { %v876_v0 = vld [vmem:[%s1187_s3 + $0x40] sm:$0xff] (!%p209_p10)   ;;  %v878_v2 = vld [vmem:[%s1187_s3 + $0x48] sm:$0xff] (!%p209_p10)   ;;  %p240_p11 = scmp.lt.s32.totalorder (!%p209_p10), %s966_s21, 1  ;;  %v880_v4 = vld [vmem:[%s1187_s3 + $0x50] sm:$0xff] (!%p209_p10)   ;;  %vm473_vm0 = vcmask (!%p209_p10), 1043456   ;;  %vm466_vm1 = vcmask (!%p209_p10), 31744  }
   0xf   : > { %212 = sbr.rel (%p209_p10) target bundleno = 981 (0x3d5), region = 40  ;;  %v877_v1 = vld [vmem:[%s1187_s3] sm:$0xff] (!%p209_p10)   ;;  %788 = vmatprep.subr.bf16.mxu0 (!%p209_p10), %v876_v0  ;;  %v879_v3 = vld [vmem:[%s1187_s3 + $0x8] sm:$0xff] (!%p209_p10)   ;;  %v881_v5 = vld [vmem:[%s1187_s3 + $0x10] sm:$0xff] (!%p209_p10)   ;;  %vm254_vm2 = vcmask (!%p209_p10), 130048   ;;  %v976_v29 = vmov (!%p209_p10), 0  }
  0x10   : > { %789 = vmatpush3.bf16.msra.mxu0 (!%p209_p10), %v877_v1  ;;  %v882_v6 = vld [vmem:[%s1187_s3 + $0x58] sm:$0xff] (!%p209_p10)   ;;  %v884_v8 = vld [vmem:[%s1187_s3 + $0x60] sm:$0xff] (!%p209_p10)   ;;  %v886_v10 = vld [vmem:[%s1187_s3 + $0x68] sm:$0xff] (!%p209_p10)   ;;  %v977_v30 = vmov (!%p209_p10), 0.0   ;;  %s787_s11 = sshll.u32 (!%p209_p10), %s966_s21, 8 }
  0x11   : > { %790 = vmatprep.subr.bf16.mxu0 (!%p209_p10), %v878_v2  ;;  %v883_v7 = vld [vmem:[%s1187_s3 + $0x18] sm:$0xff] (!%p209_p10)   ;;  %v885_v9 = vld [vmem:[%s1187_s3 + $0x20] sm:$0xff] (!%p209_p10)   ;;  %v887_v13 = vld [vmem:[%s1187_s3 + $0x28] sm:$0xff] (!%p209_p10)   ;;  %255 = vst.msk [vmem:[#allocation2] sm:$0xff] (!%p209_p10), %vm254_vm2, %v977_v30 }
  0x12   : > { %v888_v15 = vld [vmem:[%s1187_s3 + $0x70] sm:$0xff] (!%p209_p10)   ;;  %v890_v17 = vld [vmem:[%s1187_s3 + $0x78] sm:$0xff] (!%p209_p10)   ;;  %v432_v25 = vld [vmem:[%s1185_s1] sm:$0xf] (!%p209_p10) }
  0x13   : > { %v889_v16 = vld [vmem:[%s1187_s3 + $0x30] sm:$0xff] (!%p209_p10)   ;;  %v891_v18 = vld [vmem:[%s1187_s3 + $0x38] sm:$0xff] (!%p209_p10)   ;;  %813 = vmatprep.subr.msk.mxu1 (!%p209_p10), %vm473_vm0, %v432_v25  ;;  %v591_v28 = vld [vmem:[%s1186_s2] sm:$0xff] (!%p209_p10) }
  0x14   : > { %791 = vmatpush3.bf16.msra.mxu0 (!%p209_p10), %v879_v3  ;;  %814 = vmatpush3.msk.msra.mxu1 (!%p209_p10), %vm473_vm0, %v432_v25  ;;  %v895_v33 = vld [vmem:[%s1188_s4 + $0x4] ss:$8 sps:$4 sm:$0xff] (!%p209_p10)   ;;  %v893_v34 = vld [vmem:[%s1188_s4] ss:$8 sps:$4 sm:$0xff] (!%p209_p10)  }
  0x15   : > { %792 = vmatprep.subr.bf16.mxu0 (!%p209_p10), %v880_v4  ;;  %615 = vmatprep.subr.bf16.mxu1 (!%p209_p10), %v895_v33 }
  0x16   : > { %s241_s17 = scalar_select %p240_p11, %s966_s21, 1 }
  0x17   : > { %s978_s21 = smov [#allocation3]  }
  0x18   : > { %s786_s7 = sshll.u32 %s241_s17, 3  ;;  %793 = vmatpush3.bf16.msra.mxu0 %v881_v5  ;;  %v433_v35 = vld [vmem:[#allocation2] sm:$0xff]  ;;  %s900_s17 = sshll.u32 %s978_s21, 4  ;;  %s901_s17 = int_to_ptr.vmem [resolvable:$false] %s900_s17 }
  0x19   : > { %794 = vmatprep.subr.bf16.mxu0 %v882_v6  ;;  %s248_s14 = scalar_lea.vmem %s1184_s0, %s786_s7  ;;  %s237_s7 = sand.u32 1, %s958_s19  }
  0x1a   : > { %v256_v11 = vld [vmem:[%s248_s14] sm:$0xff]  ;;  %s756_s8 = sshll.u32 %s237_s7, 4  ;;  %s1139_s14 = scalar_lea.hbm %s1189_s5, %s787_s11 }
  0x1b   : > { %v258_v12 = vcombine.high %v256_v11, %v256_v11  ;;  %v260_v19 = vpack.c.bf16 %v256_v11, %v256_v11  ;;  %s239_s9 = scalar_lea.vmem [#allocation3], %s756_s8  ;;  %s659_s15 = scalar_lea.sflag [#allocation4], %s237_s7 }
  0x1c   : > { %795 = vmatpush3.bf16.msra.mxu0 %v883_v7  ;;  %s673_s10 = sshll.u32 %s239_s9, 4  ;;  %s902_s24 = scalar_lea.vmem %s901_s17, 512  ;;  %s1134_s10 = int_to_ptr.vmem [resolvable:$true] %s673_s10 }
  0x1d   : > { %796 = vmatprep.subr.bf16.mxu0 %v884_v8  ;;  %v261_v14 = vpack.c.bf16 %v258_v12, %v258_v12  ;;  %s896_s16 = scalar_lea.vmem %s1134_s10, 256  ;;  %p903_p1 = scmp.lt.s32.totalorder %s1134_s10, %s901_s17 }
  0x1e   : > { %p897_p12 = scmp.ne.s32.totalorder %s1134_s10, %s896_s16  ;;  %p904_p2 = scmp.lt.s32.totalorder %s902_s24, %s896_s16 }
  0x1f   : > { %422 = vmatprep.mubr.bf16.mxu0 %v261_v14 }
  0x20   : > { %797 = vmatpush3.bf16.msra.mxu0 %v885_v9  ;;  %p898_p13 = pnand %p897_p12, %p1049_p4  ;;  %p905_p3 = por %p904_p2, %p903_p1 }
  0x21   : > { %798 = vmatprep.subr.bf16.mxu0 %v886_v10 }
  0x22   : > { %p899_p0 = pneg %p898_p13 }
  0x24   : > { %799 = vmatpush3.bf16.msra.mxu0 %v887_v13  ;;  %p906_p5 = pnand %p905_p3, %p899_p0 }
  0x25   : > { %800 = vmatprep.subr.bf16.mxu0 %v888_v15 }
  0x28   : > { %801 = vmatpush3.bf16.msra.mxu0 %v889_v16 }
  0x29   : > { %802 = vmatprep.subr.bf16.mxu0 %v890_v17 }
  0x2c   : > { %803 = vmatpush3.bf16.msra.mxu0 %v891_v18 }
  0x2f   : > { %423 = vmatmul.mubr.bf16.vlgmr.msra.gmra.mrb[0].mxu0 %v260_v19 }
 0x102   : > { %v804_v20 = vpop.f32.mrb[0].mxu0 }
 0x103   : > { %v805_v21 = vpop.f32.mrb[1].mxu0 }
 0x104   : > { %v807_v22 = vpop.f32.mrb[2].mxu0  ;;  %v806_v23 = vadd.f32 %v805_v21, %v804_v20 }
 0x105   : > { %v808_v24 = vpop.f32.mrb[3].mxu0 }
 0x106   : > { %434 = vxpose.xlu0.b32.start.end [1/1] (short) (narrow) %v806_v23, 16 }
 0x12f   : > { %875 = vset.pattern.permute.xlu0 %v976_v29 }
 0x133   : > { %594 = vperm.xlu0 %875, %v591_v28  }
 0x186   : > { %v450_v26 = vpop.trf.xlu0 }
 0x187   : > { %815 = vmatprep.mubr.msk.f32.mxu1 %vm466_vm1, %v450_v26 }
 0x18a   : > { %v451_v27 = vpop.trf.xlu0 }
 0x18b   : > { %816 = vmatmul.mubr.msk.f32.vlgmr.msra.gmra.mrb[0].mxu1 %vm466_vm1, %v451_v27 }
 0x18c   : > { %647 = vmatprep.mubr.bf16.mxu1 %v976_v29  ;;  %616 = vmatpush1.bf16.msra.mxu1 %v893_v34 }
 0x1b2   : > { %v595_v38 = vpop.permute.xlu0 %594 }
 0x25e   : > { %v817_v31 = vpop.f32.mrb[0].mxu1 }
 0x25f   : > { %v543_v32 = vpop.f32.mrb[1].mxu1 }
 0x260   : > { %552 = vxpose.xlu1.b32.start [1/2] (short) (narrow) %v543_v32, 8 }
 0x264   : > { %553 = vxpose.xlu1.b32.end [2/2] (short) (narrow) %v817_v31, 8 }
 0x2e0   : > { %v568_v36 = vpop.trf.xlu1 }
 0x2e1   : > { %v584_v37 = vadd.f32 %v568_v36, %v433_v35 }
 0x2e3   : > { %586 = vst.msk [vmem:[#allocation2] sm:$0xff] %vm254_vm2, %v584_v37 }
 0x2ea   : > { %v590_v39 = vld [vmem:[#allocation2] sm:$0xff] }
 0x2eb   : > { %v597_v40 = vadd.f32 %v595_v38, %v590_v39 }
 0x2ed   : > { %v598_v41 = vmax.f32 %v597_v40, 0.0 }
 0x2ef   : > { %v599_v42 = vpack.c.bf16 %v598_v41, %v598_v41 }
 0x2f1   : > { %780 = vmatmul.mubr.msk.bf16.vlgmr.msra.gmra.mrb[4].mxu1 %vm254_vm2, %v599_v42 }
 0x3c4   : > { %v649_v43 = vpop.f32.mrb[4].mxu1 }
 0x3c5   : > { %656 = vst [vmem:[%s239_s9] sm:$0xff] %v649_v43  ;;  %v651_v44 = vpop.f32.mrb[5].mxu1 }
 0x3c6   : > { %657 = vst [vmem:[%s239_s9 + $0x8] sm:$0xff] %v651_v44  ;;  %v653_v45 = vpop.f32.mrb[6].mxu1 }
 0x3c7   : > { %v654_v46 = vpop.f32.mrb[7].mxu1 }
 0x3c8   : > { %909 = shalt.err (!%p906_p5)
}
 0x3c9   : > { %s910_s25 = scalar_lea.hbm %s1139_s14, 256  ;;  %s914_s7 = scalar_lea.hbm %s1189_s5, 512 }
 0x3ca   : > { %p911_p6 = scmp.ne.s32.totalorder %s1139_s14, %s910_s25  ;;  %p915_p10 = scmp.lt.u32.totalorder %s1139_s14, %s1189_s5 }
 0x3cb   : > { %p916_p11 = scmp.lt.u32.totalorder %s914_s7, %s910_s25  ;;  %p918_p13 = scmp.lt.u32.totalorder %s910_s25, %s1139_s14 }
 0x3cc   : > { %p912_p7 = pnand %p911_p6, %p1049_p4 }
 0x3cd   : > { %p917_p12 = por %p916_p11, %p915_p10 }
 0x3ce   : > { %p913_p9 = pneg %p912_p7 }
 0x3cf   : > { %p919_p0 = por %p918_p13, %p917_p12 }
 0x3d1   : > { %p920_p1 = pnand %p919_p0, %p913_p9 }
 0x3d3   : > { %923 = shalt.err (!%p920_p1)
}
 0x3d4   : > { %818 = dma.vmem_to_hbm [thread:$0]  (%p1049_p4), %s1134_s10, 256, %s1139_s14, %s659_s15  }
 0x3d5 PF: > { %p824_p2 = scmp.ge.s32.totalorder %s974_s23, 2  ;;  %s685_s11 = sand.u32 1, %s954_s18  }
 0x3d6   : > { %s686_s12 = scalar_lea.sflag [#allocation4], %s685_s11 }
 0x3d7   : > { %p821_p3 = pnand %p824_p2, %p1056_p8 }
 0x3d9   : > { %949 = dma.done.wait (!%p821_p3), %s686_s12, 256  }
 0x3da   : > { %951 = vsyncadd (!%p821_p3), %s686_s12, 4294967040  ;;  %s18_s23 = sadd.s32 1, %s974_s23   ;;  %s1192_s18 = smov %s958_s19 }
 0x3db   : > { %p15_p5 = scmp.ge.s32.totalorder %s18_s23, 4   ;;  %s1193_s19 = smov %s962_s20 }
 0x3dc   : > { %s1194_s20 = smov %s1062_s6  ;;  %s1195_s21 = smov %s970_s22 }
 0x3dd   : > { %s1196_s22 = smov %s1198_s26  ;;  %17 = sbr.rel (!%p15_p5) target bundleno = 4 (0x4), region = 84 }
 0x3e4   :  { %691 = vsyncpa [#allocation4], 1 }
 0x3e5   :  { %693 = vsyncpa [#allocation4 + $0x1], 1 }

</bundles_post_ra>
